<compile_context>
chip_gen: v6e
topology: v6e:2x2x1
jax: 0.10.0
libtpu: 0.0.40
codegen_flags: <defaults>
</compile_context>

<pallas_src>
import jax
import jax.numpy as jnp
from jax.experimental import pallas as pl
from jax.experimental.pallas import tpu as pltpu


def _patch_embed_matmul_kernel(a_ref, w_ref, b_ref, o_ref):
    # a_ref: (TM, K)  bf16 patch rows
    # w_ref: (K, TN)  bf16 reshaped conv weight tile
    # b_ref: (1, TN)  f32 bias tile
    # o_ref: (TM, TN) f32 output tile
    acc = jnp.dot(a_ref[...], w_ref[...], preferred_element_type=jnp.float32)
    o_ref[...] = (acc + b_ref[...]).astype(o_ref.dtype)


def _round_up(v, m):
    return (v + m - 1) // m * m


def _choose_tiles(N, E):
    # Lane-dense output: pad E to a multiple of 128 lanes.
    E_pad = _round_up(E, 128)
    TN = 256 if (E_pad % 256 == 0) else 128
    TN = min(TN, E_pad)
    # Row tile: target 512 (multiple of the 128/256 MXU dims, >=512 so per-step
    # overhead amortizes); clamp to the (sublane-rounded) problem for small N.
    if N >= 512:
        TM = 512
    else:
        TM = _round_up(N, 8)
    N_pad = _round_up(N, TM)
    return TM, TN, N_pad, E_pad


def patch_embed_forward(x, weight, bias, patch_size):
    """x: (B, C, H, W) float32. weight: (E, C, p, p). bias: (E,).
    Returns (B, num_patches, E) matching PyTorch patch_embed.forward."""
    B, C, H, W = x.shape
    p = patch_size
    E = weight.shape[0]
    Hp, Wp = H // p, W // p
    num_patches = Hp * Wp
    K = C * p * p
    N = B * num_patches

    # Patch extraction (layout glue, plain JAX):
    #   (B,C,Hp,p,Wp,p) -> (B,Hp,Wp,C,p,p) -> (N,K)
    # TODO(synk): fuse this transpose into the pallas_call (BlockSpec over the
    # 6-D reshape + in-kernel XLU reorder) to avoid the extra HBM round trip.
    patches = x.reshape(B, C, Hp, p, Wp, p).transpose(0, 2, 4, 1, 3, 5)
    patches = patches.reshape(N, K)

    # Conv weight (E, C, p, p) -> (K, E); bias -> (1, E)
    w2d = weight.reshape(E, K).T

    TM, TN, N_pad, E_pad = _choose_tiles(N, E)

    # Pad to tile multiples; cast MXU inputs to bf16 (f32 accumulation in-kernel).
    a = jnp.pad(patches, ((0, N_pad - N), (0, 0))).astype(jnp.bfloat16)
    w = jnp.pad(w2d, ((0, 0), (0, E_pad - E))).astype(jnp.bfloat16)
    b2d = jnp.pad(bias.reshape(1, E), ((0, 0), (0, E_pad - E))).astype(jnp.float32)

    grid = (N_pad // TM, E_pad // TN)

    out = pl.pallas_call(
        _patch_embed_matmul_kernel,
        out_shape=jax.ShapeDtypeStruct((N_pad, E_pad), x.dtype),
        grid=grid,
        in_specs=[
            pl.BlockSpec((TM, K), lambda i, j: (i, 0)),   # A strip: resident over j
            pl.BlockSpec((K, TN), lambda i, j: (0, j)),   # weight tile
            pl.BlockSpec((1, TN), lambda i, j: (0, j)),   # bias tile
        ],
        out_specs=pl.BlockSpec((TM, TN), lambda i, j: (i, j)),
        compiler_params=pltpu.CompilerParams(
            dimension_semantics=("parallel", "parallel")),
    )(a, w, b2d)

    return out[:N, :E].reshape(B, num_patches, E)


if __name__ == "__main__":
    # Small shapes consistent with the module: img_size=16, patch_size=4,
    # ch_in=4, embed_dim=32, batch=2  ->  num_patches = 16, K = 64.
    B, C, H, W = 2, 4, 16, 16
    patch_size = 4
    embed_dim = 32

    key = jax.random.PRNGKey(0)
    kx, kw, kb = jax.random.split(key, 3)
    x = jax.random.normal(kx, (B, C, H, W), dtype=jnp.float32)
    weight = 0.02 * jax.random.normal(
        kw, (embed_dim, C, patch_size, patch_size), dtype=jnp.float32)
    bias = 0.02 * jax.random.normal(kb, (embed_dim,), dtype=jnp.float32)

    out = patch_embed_forward(x, weight, bias, patch_size)
    out = jax.block_until_ready(out)

    # Reference check against lax conv (NCHW, stride=patch) + flatten/transpose.
    # (Kernel feeds the MXU bf16 inputs, so compare with bf16-appropriate tolerance.)
    ref = jax.lax.conv_general_dilated(
        x, weight, window_strides=(patch_size, patch_size), padding="VALID",
        dimension_numbers=("NCHW", "OIHW", "NCHW"))
    ref = ref + bias.reshape(1, embed_dim, 1, 1)
    ref = ref.reshape(B, embed_dim, -1).transpose(0, 2, 1)

    assert out.shape == (B, (H // patch_size) * (W // patch_size), embed_dim)
    assert jnp.allclose(out, ref, atol=2e-2, rtol=5e-2)
    print("KERNEL_OK")
</pallas_src>

<mosaic_0001>
module attributes {stable_mosaic.version = 11 : i64} {
  func.func @_patch_embed_matmul_kernel(%arg0: i32, %arg1: i32, %arg2: memref<32x64xbf16, #tpu.memory_space<vmem>>, %arg3: memref<64x128xbf16, #tpu.memory_space<vmem>>, %arg4: memref<1x128xf32, #tpu.memory_space<vmem>>, %arg5: memref<32x128xf32, #tpu.memory_space<vmem>>) attributes {dimension_semantics = [#tpu.dimension_semantics<parallel>, #tpu.dimension_semantics<parallel>], iteration_bounds = array<i64: 1, 1>, scalar_prefetch = 0 : i64, scratch_operands = 0 : i64, tpu.core_type = #tpu.core_type<tc>, window_params = [{transform_indices = @transform_0, window_bounds = array<i64: 32, 64>}, {transform_indices = @transform_1, window_bounds = array<i64: 64, 128>}, {transform_indices = @transform_2, window_bounds = array<i64: 1, 128>}, {transform_indices = @transform_3, window_bounds = array<i64: 32, 128>}]} {
    %c0 = arith.constant 0 : index
    %c0_0 = arith.constant 0 : index
    %0 = vector.load %arg2[%c0, %c0_0] : memref<32x64xbf16, #tpu.memory_space<vmem>>, vector<32x64xbf16>
    %c0_1 = arith.constant 0 : index
    %c0_2 = arith.constant 0 : index
    %1 = vector.load %arg3[%c0_1, %c0_2] : memref<64x128xbf16, #tpu.memory_space<vmem>>, vector<64x128xbf16>
    %cst = arith.constant dense<0.000000e+00> : vector<32x128xf32>
    %2 = tpu.matmul %0, %1, %cst {dimension_numbers = #tpu.dot_dimension_numbers<[1], [0], [0], [1], [0, 0, 1, 1], [], []>} : vector<32x64xbf16>, vector<64x128xbf16>, vector<32x128xf32> -> vector<32x128xf32>
    %c0_3 = arith.constant 0 : index
    %c0_4 = arith.constant 0 : index
    %3 = vector.load %arg4[%c0_3, %c0_4] : memref<1x128xf32, #tpu.memory_space<vmem>>, vector<1x128xf32>
    %4 = vector.broadcast %3 : vector<1x128xf32> to vector<32x128xf32>
    %5 = arith.addf %2, %4 : vector<32x128xf32>
    %c0_5 = arith.constant 0 : index
    %c0_6 = arith.constant 0 : index
    %6 = vector.load %arg5[%c0_5, %c0_6] : memref<32x128xf32, #tpu.memory_space<vmem>>, vector<32x128xf32>
    tpu.vector_store %arg5[%c0_5, %c0_6], %5 {strides = array<i32>} : memref<32x128xf32, #tpu.memory_space<vmem>>, vector<32x128xf32>,
    return
  }
  func.func @transform_0(%arg0: i32, %arg1: i32) -> (i32, i32) {
    %c0_i32 = arith.constant 0 : i32
    %c0_i32_0 = arith.constant 0 : i32
    return %arg0, %c0_i32 : i32, i32
  }
  func.func @transform_1(%arg0: i32, %arg1: i32) -> (i32, i32) {
    %c0_i32 = arith.constant 0 : i32
    %c0_i32_0 = arith.constant 0 : i32
    return %c0_i32, %arg1 : i32, i32
  }
  func.func @transform_2(%arg0: i32, %arg1: i32) -> (i32, i32) {
    %c0_i32 = arith.constant 0 : i32
    %c0_i32_0 = arith.constant 0 : i32
    return %c0_i32, %arg1 : i32, i32
  }
  func.func @transform_3(%arg0: i32, %arg1: i32) -> (i32, i32) {
    %c0_i32 = arith.constant 0 : i32
    return %arg0, %arg1 : i32, i32
  }
}

</mosaic_0001>

<bundles_post_ra>
// kernel: tpu_custom_call.1
= control target key start
LH: loop header
LB: loop body
LE: loop exit
PB: predicated region body
PF: predicated region fallthrough
CT: control target
= control target key end

     0   :  { %8 = vsyncpa [#allocation3], 0  ;;  %s320_s0 = inlined_call_operand.hbm [shape: bf16[32,64], index: 0, kind: input, shape index: {}]   ;;  %s321_s1 = inlined_call_operand.hbm [shape: bf16[64,128], index: 1, kind: input, shape index: {}]   ;;  %s322_s2 = inlined_call_operand.vmem [shape: f32[1,128], index: 2, kind: input, shape index: {}]   ;;  %s323_s3 = inlined_call_operand.hbm [shape: f32[32,128], index: 3, kind: output, shape index: {}]  }
   0x1   :  { %9 = vsyncpa [#allocation6], 0 }
   0x2   :  { %10 = vsyncpa [#allocation4], 0  ;;  %s281_s12 = smov [#allocation2]  }
   0x3   :  { %s16_s13 = sshll.u32 %s281_s12, 4  ;;  %s17_s13 = int_to_ptr.vmem [resolvable:$true] %s16_s13 }
   0x4   :  { %s223_s14 = scalar_lea.vmem %s17_s13, 256  ;;  %p228_p1 = scmp.lt.s32.totalorder %s17_s13, %s17_s13 }
   0x5   :  { %p224_p0 = scmp.ne.s32.totalorder %s17_s13, %s223_s14  ;;  %p229_p2 = scmp.lt.s32.totalorder %s223_s14, %s223_s14 }
   0x7   :  { %p230_p3 = por %p229_p2, %p228_p1 }
   0x9   :  { %p231_p4 = pnand %p230_p3, %p224_p0 }
   0xb   :  { %234 = shalt.err (!%p231_p4)
}
   0xc   :  { %s282_s15 = smov 64   ;;  %s283_s16 = smov 4  }
   0xd   :  { %22 = dma.hbm_to_vmem [thread:$0]  %s320_s0, 256, %s17_s13, [#allocation3], %s282_s15, %s282_s15, %s283_s16  }
   0xe   :  { %s284_s19 = smov [#allocation5]  }
   0xf   :  { %s28_s20 = sshll.u32 %s284_s19, 4  ;;  %s29_s20 = int_to_ptr.vmem [resolvable:$true] %s28_s20 }
  0x10   :  { %s243_s21 = scalar_lea.vmem %s29_s20, 512  ;;  %p248_p6 = scmp.lt.s32.totalorder %s29_s20, %s29_s20 }
  0x11   :  { %p244_p5 = scmp.ne.s32.totalorder %s29_s20, %s243_s21  ;;  %p249_p7 = scmp.lt.s32.totalorder %s243_s21, %s243_s21 }
  0x13   :  { %p250_p8 = por %p249_p7, %p248_p6 }
  0x15   :  { %p251_p9 = pnand %p250_p8, %p244_p5 }
  0x17   :  { %254 = shalt.err (!%p251_p9)
}
  0x18   :  { %34 = dma.hbm_to_vmem [thread:$0]  %s321_s1, 512, %s29_s20, [#allocation6], %s282_s15, %s282_s15, %s283_s16  }
  0x19   :  { %275 = dma.done.wait [#allocation3], 256  }
  0x1a   :  { %276 = vsyncadd [#allocation3], 4294967040 }
  0x1b   :  { %277 = dma.done.wait [#allocation6], 512  }
  0x1c   :  { %278 = vsyncadd [#allocation6], 4294966784  ;;  %v209_v0 = vld [vmem:[#allocation5 + $0x18] sm:$0xff]   ;;  %v210_v1 = vld [vmem:[#allocation5 + $0x10] sm:$0xff]   ;;  %vm97_vm0 = vcmask 523264   ;;  %s285_s24 = smov [#allocation7]  }
  0x1d   :  { %190 = vmatprep.subr.bf16.mxu0 %v209_v0  ;;  %v211_v2 = vld [vmem:[#allocation5 + $0x8] sm:$0xff]   ;;  %v213_v3 = vld [vmem:[#allocation2] sm:$0xff]   ;;  %v212_v4 = vld [vmem:[#allocation5] sm:$0xff]   ;;  %s162_s25 = sshll.u32 %s285_s24, 4  ;;  %s163_s25 = int_to_ptr.vmem [resolvable:$true] %s162_s25 }
  0x1e   :  { %191 = vmatpush3.bf16.msra.mxu0 %v209_v0  ;;  %198 = vmatprep.mubr.msk.bf16.mxu0 %vm97_vm0, %v213_v3  ;;  %v214_v5 = vld [vmem:[#allocation2 + $0x8] sm:$0xff]   ;;  %v175_v6 = vld [vmem:[%s322_s2] ss:$0 sm:$0xff]  ;;  %s255_s26 = scalar_lea.vmem %s163_s25, 512  ;;  %p260_p11 = scmp.lt.s32.totalorder %s163_s25, %s163_s25 }
  0x1f   :  { %192 = vmatprep.subr.bf16.mxu0 %v210_v1  ;;  %p256_p10 = scmp.ne.s32.totalorder %s163_s25, %s255_s26  ;;  %p261_p12 = scmp.lt.s32.totalorder %s255_s26, %s255_s26 }
  0x21   :  { %p262_p13 = por %p261_p12, %p260_p11 }
  0x22   :  { %193 = vmatpush3.bf16.msra.mxu0 %v210_v1 }
  0x23   :  { %194 = vmatprep.subr.bf16.mxu0 %v211_v2  ;;  %p263_p0 = pnand %p262_p13, %p256_p10 }
  0x26   :  { %195 = vmatpush3.bf16.msra.mxu0 %v211_v2 }
  0x27   :  { %196 = vmatprep.subr.bf16.mxu0 %v212_v4 }
  0x2a   :  { %197 = vmatpush3.bf16.msra.mxu0 %v212_v4 }
  0x2d   :  { %199 = vmatmul.mubr.msk.bf16.vlgmr.msra.gmra.mxu0 %vm97_vm0, %v214_v5 }
  0xed   :  { %v200_v7 = vpop.f32.mrf.mxu0 }
  0xee   :  { %v147_v8 = vadd.f32 %v200_v7, %v175_v6 }
  0xef   :  { %v138_v9 = vpop.f32.mrf.mxu0 }
  0xf0   :  { %155 = vst [vmem:[#allocation7 + $0x10] sm:$0xff] %v147_v8  ;;  %v139_v10 = vadd.f32 %v175_v6, %v138_v9 }
  0xf1   :  { %v201_v11 = vpop.f32.mrf.mxu0 }
  0xf2   :  { %153 = vst [vmem:[#allocation7] sm:$0xff] %v139_v10  ;;  %v150_v12 = vadd.f32 %v201_v11, %v175_v6 }
  0xf3   :  { %v141_v13 = vpop.f32.mrf.mxu0 }
  0xf4   :  { %156 = vst [vmem:[#allocation7 + $0x18] sm:$0xff] %v150_v12  ;;  %v142_v14 = vadd.f32 %v175_v6, %v141_v13 }
  0xf6   :  { %154 = vst [vmem:[#allocation7 + $0x8] sm:$0xff] %v142_v14 }
  0xf7   :  { %266 = shalt.err (!%p263_p0)
}
  0xf8   :  { %s286_s2 = smov 128   ;;  %s287_s27 = smov 8  }
  0xf9   :  { %168 = dma.vmem_to_hbm [thread:$0]  %s163_s25, 512, %s323_s3, [#allocation4], %s286_s2, %s286_s2, %s287_s27  }
  0xfa   :  { %279 = dma.done.wait [#allocation4], 512  }
  0xfb   :  { %280 = vsyncadd [#allocation4], 4294966784 }
  0xfc   :  { %172 = vsyncpa [#allocation3], 1 }
  0xfd   :  { %173 = vsyncpa [#allocation6], 1 }
  0xfe   :  { %174 = vsyncpa [#allocation4], 1 }

</bundles_post_ra>
